<compile_context>
chip_gen: v7x
topology: tpu7x:2x2x1
jax: 0.10.0
libtpu: 0.0.40
codegen_flags: <defaults>
</compile_context>

<pallas_src>
import jax
import jax.numpy as jnp
from jax.experimental import pallas as pl
from jax.experimental.pallas import tpu as pltpu

EPSILON = 1e-08

# Keep in + out blocks, each double-buffered (4 block buffers total), under
# this budget.  The 32 MiB scoped-VMEM request is safe on v5e/v6e (128 MiB
# physical) and v7x (64 MiB physical).
_VMEM_BLOCK_BUDGET_BYTES = 24 * 1024 * 1024
_VMEM_LIMIT_BYTES = 32 * 1024 * 1024


def _pixelnorm_kernel(x_ref, o_ref):
    # x_ref block: (BN, C, TILE_HW); reduce over the channel axis (1).
    c = x_ref.shape[1]
    inv_c = 1.0 / float(c)                                   # compile-time constant
    x = x_ref[...].astype(jnp.float32)
    ss = jnp.sum(x * x, axis=1, keepdims=True)               # (BN, 1, TILE_HW), XLU reduce
    out = x * jax.lax.rsqrt(ss * inv_c + EPSILON)            # single EUP rsqrt
    o_ref[...] = out.astype(o_ref.dtype)


def _choose_blocking(n, c, hw, itemsize):
    """Return (bn, tile_hw, needs_pad, hw_padded)."""
    max_block_bytes = _VMEM_BLOCK_BUDGET_BYTES // 4          # in+out, double-buffered
    full_hw_bytes = c * hw * itemsize

    # Case A: the full spatial extent fits in one block.  Use a full-extent
    # last dim (allowed even if hw % 128 != 0) -> no padding pass over HBM.
    # Also group batch rows per block to amortize per-grid-step overhead.
    if full_hw_bytes <= max_block_bytes:
        bn = 1
        for cand in range(n, 0, -1):
            if n % cand == 0 and cand * full_hw_bytes <= max_block_bytes:
                bn = cand
                break
        return bn, hw, False, hw

    # Case B: HW must be tiled -> tile must be a multiple of 128 (lane-dense,
    # unmasked stores), and HW is padded up to a multiple of 128 if needed.
    hw_pad = ((hw + 127) // 128) * 128
    best = 128
    t = 128
    while t <= hw_pad:
        if hw_pad % t == 0 and c * t * itemsize <= max_block_bytes:
            best = t
        t += 128
    # TODO(synk): if even (1, C, 128) overflows the budget (C > ~1.5M in f32)
    # the channel axis itself would need tiling + an accumulator pass.
    return 1, best, hw_pad != hw, hw_pad


def pixel_norm(x):
    """x: (N, C, H, W) -> (N, C, H, W), normalized over the channel dim."""
    N, C, H, W = x.shape
    hw = H * W
    x2 = x.reshape(N, C, hw)

    bn, tile_hw, needs_pad, hw_pad = _choose_blocking(N, C, hw, x2.dtype.itemsize)
    if needs_pad:
        # Fallback only: costs an extra HBM pass, avoided whenever the full
        # HW extent fits in a single block (Case A above).
        x2 = jnp.pad(x2, ((0, 0), (0, 0), (0, hw_pad - hw)))

    n_hw_tiles = hw_pad // tile_hw
    n_batch_tiles = N // bn

    # TODO(synk): for very small C (< 8 in f32) sublanes are under-filled; a
    # layout packing another axis into sublanes could recover ~2x VPU density,
    # but this op is HBM-bandwidth-bound so it does not change wall-clock.
    out = pl.pallas_call(
        _pixelnorm_kernel,
        out_shape=jax.ShapeDtypeStruct((N, C, hw_pad), x.dtype),
        grid_spec=pltpu.PrefetchScalarGridSpec(
            num_scalar_prefetch=0,
            grid=(n_batch_tiles, n_hw_tiles),
            in_specs=[pl.BlockSpec((bn, C, tile_hw), lambda n, t: (n, 0, t))],
            out_specs=pl.BlockSpec((bn, C, tile_hw), lambda n, t: (n, 0, t)),
        ),
        compiler_params=pltpu.CompilerParams(
            dimension_semantics=("parallel", "parallel"),
            vmem_limit_bytes=_VMEM_LIMIT_BYTES,
        ),
    )(x2)

    if needs_pad:
        out = out[:, :, :hw]
    return out.reshape(N, C, H, W)


if __name__ == "__main__":
    key = jax.random.PRNGKey(0)
    x = jax.random.normal(key, (2, 4, 16, 16), dtype=jnp.float32)

    y = jax.block_until_ready(pixel_norm(x))

    # Reference check in plain JAX (matches torch PixelNorm forward).
    ref = x / jnp.sqrt(jnp.mean(x ** 2, axis=1, keepdims=True) + EPSILON)
    assert y.shape == x.shape and y.dtype == x.dtype
    assert jnp.allclose(y, ref, atol=1e-5, rtol=1e-5)

    print("KERNEL_OK")
</pallas_src>

<mosaic_0001>
module attributes {stable_mosaic.version = 11 : i64} {
  func.func @_pixelnorm_kernel(%arg0: i32, %arg1: i32, %arg2: memref<2x4x256xf32, #tpu.memory_space<vmem>>, %arg3: memref<2x4x256xf32, #tpu.memory_space<vmem>>) attributes {dimension_semantics = [#tpu.dimension_semantics<parallel>, #tpu.dimension_semantics<parallel>], iteration_bounds = array<i64: 1, 1>, scalar_prefetch = 0 : i64, scratch_operands = 0 : i64, tpu.core_type = #tpu.core_type<tc>, window_params = [{transform_indices = @transform_0, window_bounds = array<i64: 2, 4, 256>}, {transform_indices = @transform_1, window_bounds = array<i64: 2, 4, 256>}]} {
    %c0 = arith.constant 0 : index
    %c0_0 = arith.constant 0 : index
    %c0_1 = arith.constant 0 : index
    %0 = vector.load %arg2[%c0, %c0_0, %c0_1] : memref<2x4x256xf32, #tpu.memory_space<vmem>>, vector<2x4x256xf32>
    %1 = arith.mulf %0, %0 : vector<2x4x256xf32>
    %cst = arith.constant dense<0.000000e+00> : vector<2x256xf32>
    %2 = vector.multi_reduction <add>, %1, %cst [1] : vector<2x4x256xf32> to vector<2x256xf32>
    %3 = vector.shape_cast %2 : vector<2x256xf32> to vector<2x1x256xf32>
    %cst_2 = arith.constant 2.500000e-01 : f32
    %4 = vector.broadcast %cst_2 : f32 to vector<2x1x256xf32>
    %5 = arith.mulf %3, %4 : vector<2x1x256xf32>
    %cst_3 = arith.constant 9.99999993E-9 : f32
    %6 = vector.broadcast %cst_3 : f32 to vector<2x1x256xf32>
    %7 = arith.addf %5, %6 : vector<2x1x256xf32>
    %8 = math.rsqrt %7 : vector<2x1x256xf32>
    %9 = vector.broadcast %8 : vector<2x1x256xf32> to vector<2x4x256xf32>
    %10 = arith.mulf %0, %9 : vector<2x4x256xf32>
    %c0_4 = arith.constant 0 : index
    %c0_5 = arith.constant 0 : index
    %c0_6 = arith.constant 0 : index
    %11 = vector.load %arg3[%c0_4, %c0_5, %c0_6] : memref<2x4x256xf32, #tpu.memory_space<vmem>>, vector<2x4x256xf32>
    tpu.vector_store %arg3[%c0_4, %c0_5, %c0_6], %10 {strides = array<i32>} : memref<2x4x256xf32, #tpu.memory_space<vmem>>, vector<2x4x256xf32>,
    return
  }
  func.func @transform_0(%arg0: i32, %arg1: i32) -> (i32, i32, i32) {
    %c0_i32 = arith.constant 0 : i32
    %c0_i32_0 = arith.constant 0 : i32
    return %arg0, %c0_i32, %arg1 : i32, i32, i32
  }
  func.func @transform_1(%arg0: i32, %arg1: i32) -> (i32, i32, i32) {
    %c0_i32 = arith.constant 0 : i32
    %c0_i32_0 = arith.constant 0 : i32
    return %arg0, %c0_i32, %arg1 : i32, i32, i32
  }
}

</mosaic_0001>

<bundles_post_ra>
// kernel: tpu_custom_call.1
= control target key start
LH: loop header
LB: loop body
LE: loop exit
PB: predicated region body
PF: predicated region fallthrough
CT: control target
= control target key end

     0   :  { %6 = vsyncpa [#allocation3], 0  ;;  %s207_s0 = inlined_call_operand.hbm [shape: f32[2,4,256], index: 0, kind: input, shape index: {}]   ;;  %s208_s1 = inlined_call_operand.hbm [shape: f32[2,4,256], index: 1, kind: output, shape index: {}]  }
   0x1   :  { %7 = vsyncpa [#allocation4], 0  ;;  %s163_s6 = smov [#allocation2]   ;;  %s115_s10 = scalar_lea.hbm %s207_s0, 256 }
   0x2   :  { %s13_s7 = sshll.u32 %s163_s6, 4  ;;  %p116_p0 = scmp.ne.s32.totalorder %s207_s0, %s115_s10  ;;  %s14_s7 = int_to_ptr.vmem [resolvable:$true] %s13_s7 }
   0x3   :  { %p119_p1 = scmp.lt.u32.totalorder %s115_s10, %s207_s0 }
   0x5   :  { %p121_p2 = pnand %p119_p1, %p116_p0 }
   0x7   :  { %124 = shalt.err (!%p121_p2)
}
   0x8   :  { %s125_s15 = scalar_lea.vmem %s14_s7, 256  ;;  %p130_p4 = scmp.lt.s32.totalorder %s14_s7, %s14_s7 }
   0x9   :  { %p126_p3 = scmp.ne.s32.totalorder %s14_s7, %s125_s15  ;;  %p131_p5 = scmp.lt.s32.totalorder %s125_s15, %s125_s15 }
   0xb   :  { %p132_p6 = por %p131_p5, %p130_p4 }
   0xd   :  { %p133_p7 = pnand %p132_p6, %p126_p3 }
   0xf   :  { %136 = shalt.err (!%p133_p7)
}
  0x10   :  { %s164_s16 = smov 128   ;;  %s165_s17 = smov 8  }
  0x11   :  { %19 = dma.hbm_to_vmem [thread:$0]  %s207_s0, 256, %s14_s7, [#allocation3], %s164_s16, %s164_s16, %s165_s17  }
  0x12   :  { %159 = dma.done.wait [#allocation3], 256  }
  0x13   :  { %160 = vsyncadd [#allocation3], 4294967040  ;;  %v23_v0 = vld [vmem:[#allocation2] sm:$0xff]  ;;  %vm33_vm0 = vcmask 1043456   ;;  %v24_v1 = vld [vmem:[#allocation2 + $0x8] sm:$0xff]  ;;  %s166_s0 = smov [#allocation5]  }
  0x14   :  { %v25_v2 = vmul.f32 %v23_v0, %v23_v0  ;;  %v26_v3 = vmul.f32 %v24_v1, %v24_v1  ;;  %s91_s20 = sshll.u32 %s166_s0, 4  ;;  %s92_s20 = int_to_ptr.vmem [resolvable:$true] %s91_s20 }
  0x15   :  { %s137_s21 = scalar_lea.vmem %s92_s20, 256  ;;  %p142_p9 = scmp.lt.s32.totalorder %s92_s20, %s92_s20 }
  0x16   :  { %v29_v4 = vcombine.high %v25_v2, %v25_v2  ;;  %v34_v5 = vsel %vm33_vm0, %v25_v2, 0.0  ;;  %v30_v6 = vcombine.high %v26_v3, %v26_v3  ;;  %v48_v7 = vsel %vm33_vm0, %v26_v3, 0.0  ;;  %p138_p8 = scmp.ne.s32.totalorder %s92_s20, %s137_s21  ;;  %p143_p10 = scmp.lt.s32.totalorder %s137_s21, %s137_s21 }
  0x17   :  { %v35_v8 = vrot.slane %v34_v5, 4  ;;  %v49_v9 = vrot.slane %v48_v7, 4 }
  0x18   :  { %v41_v10 = vsel %vm33_vm0, %v29_v4, 0.0  ;;  %v55_v11 = vsel %vm33_vm0, %v30_v6, 0.0  ;;  %p144_p11 = por %p143_p10, %p142_p9 }
  0x19   :  { %v36_v12 = vadd.f32 %v35_v8, %v34_v5  ;;  %v42_v13 = vrot.slane %v41_v10, 4  ;;  %v50_v14 = vadd.f32 %v49_v9, %v48_v7  ;;  %v56_v15 = vrot.slane %v55_v11, 4 }
  0x1a   :  { %p145_p12 = pnand %p144_p11, %p138_p8 }
  0x1b   :  { %v37_v16 = vrot.slane %v36_v12, 2  ;;  %v43_v17 = vadd.f32 %v42_v13, %v41_v10  ;;  %v51_v18 = vrot.slane %v50_v14, 2  ;;  %v57_v19 = vadd.f32 %v56_v15, %v55_v11 }
  0x1d   :  { %v38_v20 = vadd.f32 %v37_v16, %v36_v12  ;;  %v44_v21 = vrot.slane %v43_v17, 2  ;;  %v52_v22 = vadd.f32 %v51_v18, %v50_v14  ;;  %v58_v23 = vrot.slane %v57_v19, 2 }
  0x1f   :  { %v39_v24 = vrot.slane %v38_v20, 1  ;;  %v45_v25 = vadd.f32 %v44_v21, %v43_v17  ;;  %v53_v26 = vrot.slane %v52_v22, 1  ;;  %v59_v27 = vadd.f32 %v58_v23, %v57_v19 }
  0x21   :  { %v40_v28 = vadd.f32 %v39_v24, %v38_v20  ;;  %v46_v29 = vrot.slane %v45_v25, 1  ;;  %v54_v30 = vadd.f32 %v53_v26, %v52_v22  ;;  %v60_v31 = vrot.slane %v59_v27, 1 }
  0x23   :  { %v47_v32 = vadd.f32 %v46_v29, %v45_v25  ;;  %v62_v33 = vmul.f32 0.25, %v40_v28  ;;  %v61_v34 = vadd.f32 %v60_v31, %v59_v27  ;;  %v64_v35 = vmul.f32 0.25, %v54_v30 }
  0x25   :  { %v63_v36 = vmul.f32 0.25, %v47_v32  ;;  %v66_v37 = vadd.f32 1e-08, %v62_v33  ;;  %v65_v38 = vmul.f32 0.25, %v61_v34  ;;  %v68_v39 = vadd.f32 1e-08, %v64_v35 }
  0x27   :  { %v67_v40 = vadd.f32 1e-08, %v63_v36  ;;  %107 = vrsqrt.f32 %v66_v37  ;;  %v69_v41 = vadd.f32 1e-08, %v65_v38 }
  0x28   :  { %109 = vrsqrt.f32 %v68_v39 }
  0x29   :  { %111 = vrsqrt.f32 %v67_v40 }
  0x2a   :  { %113 = vrsqrt.f32 %v69_v41 }
  0x31   :  { %v108_v42 = vpop.eup %107 }
  0x32   :  { %v110_v43 = vpop.eup %109 }
  0x33   :  { %v112_v44 = vpop.eup %111 }
  0x34   :  { %v114_v45 = vpop.eup %113  ;;  %v78_v46 = vcombine.low %v108_v42, %v112_v44 }
  0x35   :  { %v79_v47 = vcombine.low %v110_v43, %v114_v45 }
  0x36   :  { %v82_v48 = vmul.f32 %v78_v46, %v23_v0 }
  0x37   :  { %v83_v49 = vmul.f32 %v79_v47, %v24_v1 }
  0x38   :  { %84 = vst [vmem:[#allocation5] sm:$0xff] %v82_v48 }
  0x39   :  { %85 = vst [vmem:[#allocation5 + $0x8] sm:$0xff] %v83_v49 }
  0x3a   :  { %148 = shalt.err (!%p145_p12)
}
  0x3b   :  { %s149_s24 = scalar_lea.hbm %s208_s1, 256 }
  0x3c   :  { %p150_p13 = scmp.ne.s32.totalorder %s208_s1, %s149_s24  ;;  %p153_p0 = scmp.lt.u32.totalorder %s149_s24, %s208_s1 }
  0x3e   :  { %p155_p1 = pnand %p153_p0, %p150_p13 }
  0x40   :  { %158 = shalt.err (!%p155_p1)
}
  0x41   :  { %97 = dma.vmem_to_hbm [thread:$0]  %s92_s20, 256, %s208_s1, [#allocation4], %s164_s16, %s164_s16, %s165_s17  }
  0x42   :  { %161 = dma.done.wait [#allocation4], 256  }
  0x43   :  { %162 = vsyncadd [#allocation4], 4294967040 }
  0x44   :  { %101 = vsyncpa [#allocation3], 1 }
  0x45   :  { %102 = vsyncpa [#allocation4], 1 }

</bundles_post_ra>
